<compile_context>
chip_gen: v7x
topology: tpu7x:2x2x1
jax: 0.10.0
libtpu: 0.0.40
codegen_flags: <defaults>
</compile_context>

<pallas_src>
import jax
import jax.numpy as jnp
from jax.experimental import pallas as pl
from jax.experimental.pallas import tpu as pltpu


def _erf_exact_f32(x):
    """erf(x) via Abramowitz & Stegun 7.1.26 (max abs error 1.5e-7).

    Uses only abs/mul/add/div/exp, which lower to VPU/EUP ops in Mosaic, so we
    do not rely on a lax.erf lowering rule.  Accurate enough to match
    F.gelu(approximate='none') well below test tolerances.
    """
    a1 = jnp.float32(0.254829592)
    a2 = jnp.float32(-0.284496736)
    a3 = jnp.float32(1.421413741)
    a4 = jnp.float32(-1.453152027)
    a5 = jnp.float32(1.061405429)
    p = jnp.float32(0.3275911)
    ax = jnp.abs(x)
    t = 1.0 / (1.0 + p * ax)
    poly = ((((a5 * t + a4) * t + a3) * t + a2) * t + a1) * t
    y = 1.0 - poly * jnp.exp(-ax * ax)          # exp -> EUP (free-ish slot)
    return jnp.where(x < 0, -y, y)


def _gelu_exact_f32(g):
    inv_sqrt2 = jnp.float32(0.7071067811865476)
    return 0.5 * g * (1.0 + _erf_exact_f32(g * inv_sqrt2))


def _geglu_ff_kernel(x_ref, w1h_ref, w1g_ref, b1h_ref, b1g_ref,
                     w2_ref, b2_ref, o_ref, acc_ref):
    # x_ref  : (TM, dim)           native (bf16/f32) operand -> MXU
    # w1h/w1g: (dim, TN)           b1h/b1g: (1, TN) f32
    # w2_ref : (TN, dim_out)       b2_ref : (1, dim_out) f32
    # o_ref  : (TM, dim_out)       acc_ref: (TM, dim_out) f32 scratch
    j = pl.program_id(1)

    @pl.when(j == 0)
    def _init():
        # Fold the output bias into the accumulator init (added exactly once).
        acc_ref[...] = jnp.broadcast_to(b2_ref[...], acc_ref.shape)

    x = x_ref[...]  # keep native dtype; f32 accumulation via preferred_element_type

    hidden = jnp.dot(x, w1h_ref[...], preferred_element_type=jnp.float32)
    hidden = hidden + b1h_ref[...]

    gate = jnp.dot(x, w1g_ref[...], preferred_element_type=jnp.float32)
    gate = gate + b1g_ref[...]

    # GEGLU: hidden * gelu_exact(gate), all in f32.
    act = hidden * _gelu_exact_f32(gate)

    # Accumulate this inner-dim slab's contribution to the second projection.
    acc_ref[...] += jnp.dot(act.astype(w2_ref.dtype), w2_ref[...],
                            preferred_element_type=jnp.float32)

    @pl.when(j == pl.num_programs(1) - 1)
    def _store():
        o_ref[...] = acc_ref[...].astype(o_ref.dtype)


def feedforward_geglu(x, w1, b1, w2, b2, *, tile_m=None, tile_inner=None,
                      compute_dtype=jnp.bfloat16):
    """x: (B, S, dim); w1: (dim, 2*inner); b1: (2*inner,);
    w2: (inner, dim_out); b2: (dim_out,).  Returns (B, S, dim_out) in x.dtype.

    compute_dtype: dtype for MXU operands (x, W1, W2).  Default bf16 (f32
    accumulation).  Pass None to keep the input dtype (exact-precision path).
    """
    B, S, dim = x.shape
    two_inner = w1.shape[1]
    inner = two_inner // 2
    dim_out = w2.shape[1]
    M = B * S
    out_dtype = x.dtype

    # ---- operand dtypes ------------------------------------------------
    if compute_dtype is not None:
        x_op = x.astype(compute_dtype)
        w1_op = w1.astype(compute_dtype)
        w2_op = w2.astype(compute_dtype)
    else:
        x_op, w1_op, w2_op = x, w1, w2

    # Split the GEGLU projection into hidden/gate slabs outside the kernel
    # (avoids lane-axis slicing of a materialized (TM, 2*inner) intermediate).
    w1h = w1_op[:, :inner]
    w1g = w1_op[:, inner:]
    # Biases stay f32 (tiny DMA, better precision).
    b1h = b1[:inner].astype(jnp.float32).reshape(1, inner)
    b1g = b1[inner:].astype(jnp.float32).reshape(1, inner)
    b2_2d = b2.astype(jnp.float32).reshape(1, dim_out)

    itemsize = jnp.dtype(x_op.dtype).itemsize
    out_itemsize = jnp.dtype(out_dtype).itemsize

    # ---- reduction (inner-dim) slab -------------------------------------
    if tile_inner is not None:
        tn = tile_inner
    elif inner > 512 and inner % 512 == 0:
        tn = 512
    else:
        tn = inner
    assert inner % tn == 0, "tile_inner must divide inner_dim"

    # ---- VMEM budget & M-tile selection ---------------------------------
    try:
        info = pltpu.get_tpu_info()
        vmem_cap = int(getattr(info, "vmem_capacity_bytes", 64 * 1024 * 1024))
    except Exception:  # no TPU info available -> assume smallest (v7x per-TC)
        vmem_cap = 64 * 1024 * 1024
    budget = min(48 * 1024 * 1024, int(vmem_cap * 0.65))

    def _footprint(tm):
        # double-buffered input/output tiles + f32 accumulator + f32 intermediates
        io = 2 * (tm * dim * itemsize                  # x row tile
                  + 2 * dim * tn * itemsize            # W1 hidden + gate slabs
                  + tn * dim_out * itemsize            # W2 row slab
                  + (2 * tn + dim_out) * 4             # biases (f32)
                  + tm * dim_out * out_itemsize)       # output tile
        acc = tm * dim_out * 4
        interm = 3 * tm * tn * 4                       # hidden / gate / act (f32)
        return io + acc + interm

    if tile_m is not None:
        tm = tile_m
    else:
        tm = 128
        for cand in (1024, 768, 512, 384, 256, 128):
            if _footprint(cand) <= budget:
                tm = cand
                break
    tm = min(tm, M)   # tm is a multiple of 8, or equals the full M extent

    x2d = x_op.reshape(M, dim)
    grid = (pl.cdiv(M, tm), inner // tn)   # ragged last M tile: OOB rows dropped

    vmem_limit = int(min(max(2 * _footprint(tm), 32 * 1024 * 1024),
                         int(vmem_cap * 0.9)))

    out2d = pl.pallas_call(
        _geglu_ff_kernel,
        out_shape=jax.ShapeDtypeStruct((M, dim_out), out_dtype),
        grid=grid,
        in_specs=[
            pl.BlockSpec((tm, dim), lambda i, j: (i, 0)),       # x row tile
            pl.BlockSpec((dim, tn), lambda i, j: (0, j)),       # W1 hidden slab
            pl.BlockSpec((dim, tn), lambda i, j: (0, j)),       # W1 gate slab
            pl.BlockSpec((1, tn), lambda i, j: (0, j)),         # b1 hidden
            pl.BlockSpec((1, tn), lambda i, j: (0, j)),         # b1 gate
            pl.BlockSpec((tn, dim_out), lambda i, j: (j, 0)),   # W2 row slab
            pl.BlockSpec((1, dim_out), lambda i, j: (0, 0)),    # b2
        ],
        out_specs=pl.BlockSpec((tm, dim_out), lambda i, j: (i, 0)),
        scratch_shapes=[pltpu.VMEM((tm, dim_out), jnp.float32)],
        compiler_params=pltpu.CompilerParams(
            dimension_semantics=("parallel", "arbitrary"),
            vmem_limit_bytes=vmem_limit),
    )(x2d, w1h, w1g, b1h, b1g, w2_op, b2_2d)

    # TODO(synk): for production shapes with small/unaligned dim or dim_out,
    # pad them to a lane-dense multiple of 128/256 on the wrapper side.
    return out2d.reshape(B, S, dim_out)


def _reference(x, w1, b1, w2, b2):
    # Pure-JAX reference of the PyTorch FeedForward forward pass (geglu, p=0).
    h = jnp.einsum("bsd,df->bsf", x, w1) + b1
    inner = w2.shape[0]
    hidden, gate = h[..., :inner], h[..., inner:]
    gelu_gate = 0.5 * gate * (1.0 + jax.lax.erf(gate / jnp.sqrt(2.0)))
    act = hidden * gelu_gate
    return jnp.einsum("bsf,fo->bso", act, w2) + b2


if __name__ == "__main__":
    # Small shapes consistent with the module: dim=32, mult=4 -> inner=128.
    B, S, dim = 2, 8, 32
    mult = 4
    inner = dim * mult          # 128
    dim_out = dim               # defaults to dim

    key = jax.random.PRNGKey(0)
    k_x, k_w1, k_b1, k_w2, k_b2 = jax.random.split(key, 5)

    x = jax.random.normal(k_x, (B, S, dim), dtype=jnp.float32)
    # Linear(dim, 2*inner) and Linear(inner, dim_out), stored as (in, out)
    # so the kernel computes x @ W + b.
    w1 = jax.random.normal(k_w1, (dim, 2 * inner), dtype=jnp.float32) * 0.05
    b1 = jax.random.normal(k_b1, (2 * inner,), dtype=jnp.float32) * 0.05
    w2 = jax.random.normal(k_w2, (inner, dim_out), dtype=jnp.float32) * 0.05
    b2 = jax.random.normal(k_b2, (dim_out,), dtype=jnp.float32) * 0.05

    ref = _reference(x, w1, b1, w2, b2)

    # Exact-precision path (operands kept in f32).
    out_f32 = feedforward_geglu(x, w1, b1, w2, b2, compute_dtype=None)
    jax.block_until_ready(out_f32)
    assert out_f32.shape == (B, S, dim_out)
    assert jnp.allclose(out_f32, ref, atol=5e-3, rtol=5e-3)

    # Default fast path: bf16 operands on the MXU, f32 accumulation.
    out_bf16 = feedforward_geglu(x, w1, b1, w2, b2)
    jax.block_until_ready(out_bf16)
    assert out_bf16.shape == (B, S, dim_out)
    assert jnp.allclose(out_bf16, ref, atol=3e-2, rtol=3e-2)

    print("KERNEL_OK")
</pallas_src>

<mosaic_0001>
module attributes {stable_mosaic.version = 11 : i64} {
  func.func @_geglu_ff_kernel(%arg0: i32, %arg1: i32, %arg2: memref<16x32xf32, #tpu.memory_space<vmem>>, %arg3: memref<32x128xf32, #tpu.memory_space<vmem>>, %arg4: memref<32x128xf32, #tpu.memory_space<vmem>>, %arg5: memref<1x128xf32, #tpu.memory_space<vmem>>, %arg6: memref<1x128xf32, #tpu.memory_space<vmem>>, %arg7: memref<128x32xf32, #tpu.memory_space<vmem>>, %arg8: memref<1x32xf32, #tpu.memory_space<vmem>>, %arg9: memref<16x32xf32, #tpu.memory_space<vmem>>, %arg10: memref<16x32xf32, #tpu.memory_space<vmem>>) attributes {dimension_semantics = [#tpu.dimension_semantics<parallel>, #tpu.dimension_semantics<arbitrary>], iteration_bounds = array<i64: 1, 1>, scalar_prefetch = 0 : i64, scratch_operands = 1 : i64, tpu.core_type = #tpu.core_type<tc>, window_params = [{transform_indices = @transform_0, window_bounds = array<i64: 16, 32>}, {transform_indices = @transform_1, window_bounds = array<i64: 32, 128>}, {transform_indices = @transform_2, window_bounds = array<i64: 32, 128>}, {transform_indices = @transform_3, window_bounds = array<i64: 1, 128>}, {transform_indices = @transform_4, window_bounds = array<i64: 1, 128>}, {transform_indices = @transform_5, window_bounds = array<i64: 128, 32>}, {pipeline_mode = #tpu.pipeline_mode<synchronous>, transform_indices = @transform_6, window_bounds = array<i64: 1, 32>}, {transform_indices = @transform_7, window_bounds = array<i64: 16, 32>}]} {
    %c0_i32 = arith.constant 0 : i32
    %0 = arith.cmpi eq, %arg1, %c0_i32 : i32
    %1 = arith.extui %0 : i1 to i32
    %c0_i32_0 = arith.constant 0 : i32
    %2 = arith.cmpi ne, %1, %c0_i32_0 : i32
    scf.if %2 {
      %c0_35 = arith.constant 0 : index
      %c0_36 = arith.constant 0 : index
      %63 = vector.load %arg8[%c0_35, %c0_36] : memref<1x32xf32, #tpu.memory_space<vmem>>, vector<1x32xf32>
      %64 = vector.shape_cast %63 : vector<1x32xf32> to vector<1x32xf32>
      %65 = vector.broadcast %64 : vector<1x32xf32> to vector<16x32xf32>
      %c0_37 = arith.constant 0 : index
      %c0_38 = arith.constant 0 : index
      %66 = vector.load %arg10[%c0_37, %c0_38] : memref<16x32xf32, #tpu.memory_space<vmem>>, vector<16x32xf32>
      tpu.vector_store %arg10[%c0_37, %c0_38], %65 {strides = array<i32>} : memref<16x32xf32, #tpu.memory_space<vmem>>, vector<16x32xf32>,
    } else {
    }
    %c0 = arith.constant 0 : index
    %c0_1 = arith.constant 0 : index
    %3 = vector.load %arg2[%c0, %c0_1] : memref<16x32xf32, #tpu.memory_space<vmem>>, vector<16x32xf32>
    %c0_2 = arith.constant 0 : index
    %c0_3 = arith.constant 0 : index
    %4 = vector.load %arg3[%c0_2, %c0_3] : memref<32x128xf32, #tpu.memory_space<vmem>>, vector<32x128xf32>
    %cst = arith.constant dense<0.000000e+00> : vector<16x128xf32>
    %5 = tpu.matmul %3, %4, %cst {dimension_numbers = #tpu.dot_dimension_numbers<[1], [0], [0], [1], [0, 0, 1, 1], [], []>} : vector<16x32xf32>, vector<32x128xf32>, vector<16x128xf32> -> vector<16x128xf32>
    %c0_4 = arith.constant 0 : index
    %c0_5 = arith.constant 0 : index
    %6 = vector.load %arg5[%c0_4, %c0_5] : memref<1x128xf32, #tpu.memory_space<vmem>>, vector<1x128xf32>
    %7 = vector.broadcast %6 : vector<1x128xf32> to vector<16x128xf32>
    %8 = arith.addf %5, %7 : vector<16x128xf32>
    %c0_6 = arith.constant 0 : index
    %c0_7 = arith.constant 0 : index
    %9 = vector.load %arg4[%c0_6, %c0_7] : memref<32x128xf32, #tpu.memory_space<vmem>>, vector<32x128xf32>
    %cst_8 = arith.constant dense<0.000000e+00> : vector<16x128xf32>
    %10 = tpu.matmul %3, %9, %cst_8 {dimension_numbers = #tpu.dot_dimension_numbers<[1], [0], [0], [1], [0, 0, 1, 1], [], []>} : vector<16x32xf32>, vector<32x128xf32>, vector<16x128xf32> -> vector<16x128xf32>
    %c0_9 = arith.constant 0 : index
    %c0_10 = arith.constant 0 : index
    %11 = vector.load %arg6[%c0_9, %c0_10] : memref<1x128xf32, #tpu.memory_space<vmem>>, vector<1x128xf32>
    %12 = vector.broadcast %11 : vector<1x128xf32> to vector<16x128xf32>
    %13 = arith.addf %10, %12 : vector<16x128xf32>
    %cst_11 = arith.constant 5.000000e-01 : f32
    %14 = vector.broadcast %cst_11 : f32 to vector<16x128xf32>
    %15 = arith.mulf %14, %13 : vector<16x128xf32>
    %cst_12 = arith.constant 0.707106769 : f32
    %16 = vector.broadcast %cst_12 : f32 to vector<16x128xf32>
    %17 = arith.mulf %13, %16 : vector<16x128xf32>
    %18 = math.absf %17 : vector<16x128xf32>
    %cst_13 = arith.constant 0.327591091 : f32
    %19 = vector.broadcast %cst_13 : f32 to vector<16x128xf32>
    %20 = arith.mulf %19, %18 : vector<16x128xf32>
    %cst_14 = arith.constant 1.000000e+00 : f32
    %21 = vector.broadcast %cst_14 : f32 to vector<16x128xf32>
    %22 = arith.addf %21, %20 : vector<16x128xf32>
    %cst_15 = arith.constant 1.000000e+00 : f32
    %23 = vector.broadcast %cst_15 : f32 to vector<16x128xf32>
    %24 = arith.divf %23, %22 : vector<16x128xf32>
    %cst_16 = arith.constant 1.06140542 : f32
    %25 = vector.broadcast %cst_16 : f32 to vector<16x128xf32>
    %26 = arith.mulf %25, %24 : vector<16x128xf32>
    %cst_17 = arith.constant -1.45315206 : f32
    %27 = vector.broadcast %cst_17 : f32 to vector<16x128xf32>
    %28 = arith.addf %26, %27 : vector<16x128xf32>
    %29 = arith.mulf %28, %24 : vector<16x128xf32>
    %cst_18 = arith.constant 1.42141378 : f32
    %30 = vector.broadcast %cst_18 : f32 to vector<16x128xf32>
    %31 = arith.addf %29, %30 : vector<16x128xf32>
    %32 = arith.mulf %31, %24 : vector<16x128xf32>
    %cst_19 = arith.constant -0.284496725 : f32
    %33 = vector.broadcast %cst_19 : f32 to vector<16x128xf32>
    %34 = arith.addf %32, %33 : vector<16x128xf32>
    %35 = arith.mulf %34, %24 : vector<16x128xf32>
    %cst_20 = arith.constant 0.254829586 : f32
    %36 = vector.broadcast %cst_20 : f32 to vector<16x128xf32>
    %37 = arith.addf %35, %36 : vector<16x128xf32>
    %38 = arith.mulf %37, %24 : vector<16x128xf32>
    %cst_21 = arith.constant 0.000000e+00 : f32
    %39 = vector.broadcast %cst_21 : f32 to vector<16x128xf32>
    %40 = arith.subf %39, %18 : vector<16x128xf32>
    %41 = arith.mulf %40, %18 : vector<16x128xf32>
    %42 = math.exp %41 : vector<16x128xf32>
    %43 = arith.mulf %38, %42 : vector<16x128xf32>
    %cst_22 = arith.constant 1.000000e+00 : f32
    %44 = vector.broadcast %cst_22 : f32 to vector<16x128xf32>
    %45 = arith.subf %44, %43 : vector<16x128xf32>
    %cst_23 = arith.constant 0.000000e+00 : f32
    %46 = vector.broadcast %cst_23 : f32 to vector<16x128xf32>
    %47 = arith.cmpf olt, %17, %46 : vector<16x128xf32>
    %cst_24 = arith.constant 0.000000e+00 : f32
    %48 = vector.broadcast %cst_24 : f32 to vector<16x128xf32>
    %49 = arith.subf %48, %45 : vector<16x128xf32>
    %50 = arith.select %47, %49, %45 : vector<16x128xi1>, vector<16x128xf32>
    %cst_25 = arith.constant 1.000000e+00 : f32
    %51 = vector.broadcast %cst_25 : f32 to vector<16x128xf32>
    %52 = arith.addf %51, %50 : vector<16x128xf32>
    %53 = arith.mulf %15, %52 : vector<16x128xf32>
    %54 = arith.mulf %8, %53 : vector<16x128xf32>
    %c0_26 = arith.constant 0 : index
    %c0_27 = arith.constant 0 : index
    %55 = vector.load %arg10[%c0_26, %c0_27] : memref<16x32xf32, #tpu.memory_space<vmem>>, vector<16x32xf32>
    %c0_28 = arith.constant 0 : index
    %c0_29 = arith.constant 0 : index
    %56 = vector.load %arg7[%c0_28, %c0_29] : memref<128x32xf32, #tpu.memory_space<vmem>>, vector<128x32xf32>
    %cst_30 = arith.constant dense<0.000000e+00> : vector<16x32xf32>
    %57 = tpu.matmul %54, %56, %cst_30 {dimension_numbers = #tpu.dot_dimension_numbers<[1], [0], [0], [1], [0, 0, 1, 1], [], []>} : vector<16x128xf32>, vector<128x32xf32>, vector<16x32xf32> -> vector<16x32xf32>
    %58 = arith.addf %55, %57 : vector<16x32xf32>
    %c0_31 = arith.constant 0 : index
    %c0_32 = arith.constant 0 : index
    %59 = vector.load %arg10[%c0_31, %c0_32] : memref<16x32xf32, #tpu.memory_space<vmem>>, vector<16x32xf32>
    tpu.vector_store %arg10[%c0_31, %c0_32], %58 {strides = array<i32>} : memref<16x32xf32, #tpu.memory_space<vmem>>, vector<16x32xf32>,
    %c0_i32_33 = arith.constant 0 : i32
    %60 = arith.cmpi eq, %arg1, %c0_i32_33 : i32
    %61 = arith.extui %60 : i1 to i32
    %c0_i32_34 = arith.constant 0 : i32
    %62 = arith.cmpi ne, %61, %c0_i32_34 : i32
    scf.if %62 {
      %c0_35 = arith.constant 0 : index
      %c0_36 = arith.constant 0 : index
      %63 = vector.load %arg10[%c0_35, %c0_36] : memref<16x32xf32, #tpu.memory_space<vmem>>, vector<16x32xf32>
      %c0_37 = arith.constant 0 : index
      %c0_38 = arith.constant 0 : index
      %64 = vector.load %arg9[%c0_37, %c0_38] : memref<16x32xf32, #tpu.memory_space<vmem>>, vector<16x32xf32>
      tpu.vector_store %arg9[%c0_37, %c0_38], %63 {strides = array<i32>} : memref<16x32xf32, #tpu.memory_space<vmem>>, vector<16x32xf32>,
    } else {
    }
    return
  }
  func.func @transform_0(%arg0: i32, %arg1: i32) -> (i32, i32) {
    %c0_i32 = arith.constant 0 : i32
    %c0_i32_0 = arith.constant 0 : i32
    return %arg0, %c0_i32 : i32, i32
  }
  func.func @transform_1(%arg0: i32, %arg1: i32) -> (i32, i32) {
    %c0_i32 = arith.constant 0 : i32
    %c0_i32_0 = arith.constant 0 : i32
    return %c0_i32, %arg1 : i32, i32
  }
  func.func @transform_2(%arg0: i32, %arg1: i32) -> (i32, i32) {
    %c0_i32 = arith.constant 0 : i32
    %c0_i32_0 = arith.constant 0 : i32
    return %c0_i32, %arg1 : i32, i32
  }
  func.func @transform_3(%arg0: i32, %arg1: i32) -> (i32, i32) {
    %c0_i32 = arith.constant 0 : i32
    %c0_i32_0 = arith.constant 0 : i32
    return %c0_i32, %arg1 : i32, i32
  }
  func.func @transform_4(%arg0: i32, %arg1: i32) -> (i32, i32) {
    %c0_i32 = arith.constant 0 : i32
    %c0_i32_0 = arith.constant 0 : i32
    return %c0_i32, %arg1 : i32, i32
  }
  func.func @transform_5(%arg0: i32, %arg1: i32) -> (i32, i32) {
    %c0_i32 = arith.constant 0 : i32
    %c0_i32_0 = arith.constant 0 : i32
    return %arg1, %c0_i32 : i32, i32
  }
  func.func @transform_6(%arg0: i32, %arg1: i32) -> (i32, i32) {
    %c0_i32 = arith.constant 0 : i32
    %c0_i32_0 = arith.constant 0 : i32
    %c0_i32_1 = arith.constant 0 : i32
    return %c0_i32, %c0_i32_0 : i32, i32
  }
  func.func @transform_7(%arg0: i32, %arg1: i32) -> (i32, i32) {
    %c0_i32 = arith.constant 0 : i32
    %c0_i32_0 = arith.constant 0 : i32
    return %arg0, %c0_i32 : i32, i32
  }
}

</mosaic_0001>

<bundles_post_ra>
// kernel: tpu_custom_call.1
= control target key start
LH: loop header
LB: loop body
LE: loop exit
PB: predicated region body
PF: predicated region fallthrough
CT: control target
= control target key end

     0   :  { %vm38_vm0 = vcmask 261120   ;;  %s730_s0 = inlined_call_operand.vmem [shape: f32[16,32], index: 0, kind: input, shape index: {}]   ;;  %s731_s1 = inlined_call_operand.vmem [shape: f32[32,128], index: 1, kind: input, shape index: {}]   ;;  %s732_s2 = inlined_call_operand.vmem [shape: f32[32,128], index: 2, kind: input, shape index: {}]   ;;  %s733_s3 = inlined_call_operand.vmem [shape: f32[1,128], index: 3, kind: input, shape index: {}]   ;;  %s734_s4 = inlined_call_operand.vmem [shape: f32[1,128], index: 4, kind: input, shape index: {}]   ;;  %s735_s5 = inlined_call_operand.vmem [shape: f32[128,32], index: 5, kind: input, shape index: {}]   ;;  %s736_s6 = inlined_call_operand.vmem [shape: f32[1,32], index: 6, kind: input, shape index: {}]   ;;  %s737_s7 = inlined_call_operand.hbm [shape: f32[16,32], index: 7, kind: output, shape index: {}]  }
   0x1   :  { %v43_v0 = vld [vmem:[%s731_s1] sm:$0xff]  ;;  %v44_v1 = vld [vmem:[%s731_s1 + $0x8] sm:$0xff]  ;;  %v45_v2 = vld [vmem:[%s731_s1 + $0x10] sm:$0xff] }
   0x2   :  { %v492_v3 = vpack.c.bf16 %v44_v1, %v43_v0  ;;  %v46_v4 = vld [vmem:[%s731_s1 + $0x18] sm:$0xff]  ;;  %v41_v5 = vld [vmem:[%s730_s0] sm:$0xff]  ;;  %v137_v8 = vld [vmem:[%s732_s2 + $0x8] sm:$0xff] }
   0x3   :  { %v496_v6 = vpack.c.bf16 %v46_v4, %v45_v2  ;;  %443 = vmatprep.mubr.msk.f32.mxu1 %vm38_vm0, %v41_v5  ;;  %v136_v7 = vld [vmem:[%s732_s2] sm:$0xff] }
   0x4   :  { %493 = vmatprep.subr.bf16.mxu1 %v492_v3 }
   0x5   :  { %12 = vsyncpa [#allocation4], 0  ;;  %495 = vmatpush3.bf16.msra.mxu1 %v492_v3  ;;  %v500_v9 = vpack.c.bf16 %v137_v8, %v136_v7  ;;  %v138_v10 = vld [vmem:[%s732_s2 + $0x10] sm:$0xff]  ;;  %v139_v11 = vld [vmem:[%s732_s2 + $0x18] sm:$0xff] }
   0x6   :  { %497 = vmatprep.subr.bf16.mxu1 %v496_v6  ;;  %v42_v12 = vld [vmem:[%s730_s0 + $0x8] sm:$0xff]  ;;  %v504_v13 = vpack.c.bf16 %v139_v11, %v138_v10  ;;  %v280_v14 = vld [vmem:[%s735_s5] sm:$0xff]  ;;  %v282_v17 = vld [vmem:[%s735_s5 + $0x10] sm:$0xff] }
   0x7   :  { %v281_v15 = vld [vmem:[%s735_s5 + $0x8] sm:$0xff]  ;;  %v283_v18 = vld [vmem:[%s735_s5 + $0x18] sm:$0xff]  ;;  %v284_v20 = vld [vmem:[%s735_s5 + $0x20] sm:$0xff] }
   0x8   :  { %v508_v16 = vpack.c.bf16 %v281_v15, %v280_v14  ;;  %v512_v19 = vpack.c.bf16 %v283_v18, %v282_v17  ;;  %v285_v21 = vld [vmem:[%s735_s5 + $0x28] sm:$0xff]  ;;  %v286_v23 = vld [vmem:[%s735_s5 + $0x30] sm:$0xff]  ;;  %v287_v24 = vld [vmem:[%s735_s5 + $0x38] sm:$0xff] }
   0x9   :  { %499 = vmatpush3.bf16.msra.mxu1 %v496_v6  ;;  %v516_v22 = vpack.c.bf16 %v285_v21, %v284_v20  ;;  %v520_v25 = vpack.c.bf16 %v287_v24, %v286_v23  ;;  %v288_v26 = vld [vmem:[%s735_s5 + $0x40] sm:$0xff]  ;;  %v289_v27 = vld [vmem:[%s735_s5 + $0x48] sm:$0xff]  ;;  %v290_v29 = vld [vmem:[%s735_s5 + $0x50] sm:$0xff] }
   0xa   :  { %501 = vmatprep.subr.bf16.mxu1 %v500_v9  ;;  %509 = vmatprep.subr.bf16.mxu0 %v508_v16  ;;  %v524_v28 = vpack.c.bf16 %v289_v27, %v288_v26  ;;  %v291_v30 = vld [vmem:[%s735_s5 + $0x58] sm:$0xff]  ;;  %v292_v32 = vld [vmem:[%s735_s5 + $0x60] sm:$0xff]  ;;  %v293_v33 = vld [vmem:[%s735_s5 + $0x68] sm:$0xff] }
   0xb   :  { %511 = vmatpush3.bf16.msra.mxu0 %v508_v16  ;;  %v528_v31 = vpack.c.bf16 %v291_v30, %v290_v29  ;;  %v532_v34 = vpack.c.bf16 %v293_v33, %v292_v32  ;;  %v294_v35 = vld [vmem:[%s735_s5 + $0x70] sm:$0xff]  ;;  %v295_v36 = vld [vmem:[%s735_s5 + $0x78] sm:$0xff]  ;;  %v398_v38 = vld [vmem:[%s736_s6] ss:$0 sm:$0xff] }
   0xc   :  { %444 = vmatmul.mubr.msk.f32.vlgmr.msra.gmra.mrb[0].mxu1 %vm38_vm0, %v42_v12  ;;  %513 = vmatprep.subr.bf16.mxu0 %v512_v19  ;;  %v536_v37 = vpack.c.bf16 %v295_v36, %v294_v35  ;;  %40 = vst.msk [vmem:[#allocation2 + $0x8] sm:$0xff] %vm38_vm0, %v398_v38  ;;  %39 = vst.msk [vmem:[#allocation2] sm:$0xff] %vm38_vm0, %v398_v38  ;;  %v402_v41 = vld [vmem:[%s734_s4] ss:$0 sm:$0xff] }
   0xd   :  { %503 = vmatpush3.bf16.msra.mxu1 %v500_v9  ;;  %454 = vmatprep.mubr.msk.f32.mxu1 %vm38_vm0, %v41_v5  ;;  %v399_v24 = vld [vmem:[%s733_s3] ss:$0 sm:$0xff]  ;;  %s575_s3 = smov [#allocation3]  }
   0xe   :  { %505 = vmatprep.subr.bf16.mxu1 %v504_v13  ;;  %s387_s6 = sshll.u32 %s575_s3, 4  ;;  %s388_s6 = int_to_ptr.vmem [resolvable:$true] %s387_s6 }
   0xf   :  { %515 = vmatpush3.bf16.msra.mxu0 %v512_v19  ;;  %s551_s28 = scalar_lea.vmem %s388_s6, 256  ;;  %p556_p1 = scmp.lt.s32.totalorder %s388_s6, %s388_s6 }
  0x10   :  { %517 = vmatprep.subr.bf16.mxu0 %v516_v22  ;;  %p552_p0 = scmp.ne.s32.totalorder %s388_s6, %s551_s28  ;;  %p557_p2 = scmp.lt.s32.totalorder %s551_s28, %s551_s28 }
  0x11   :  { %507 = vmatpush3.bf16.msra.mxu1 %v504_v13 }
  0x12   :  { %p558_p3 = por %p557_p2, %p556_p1 }
  0x13   :  { %519 = vmatpush3.bf16.msra.mxu0 %v516_v22  ;;  %v278_v38 = vld [vmem:[#allocation2] sm:$0xff] }
  0x14   :  { %455 = vmatmul.mubr.msk.f32.vlgmr.msra.gmra.mrb[2].mxu1 %vm38_vm0, %v42_v12  ;;  %521 = vmatprep.subr.bf16.mxu0 %v520_v25  ;;  %p559_p4 = pnand %p558_p3, %p552_p0 }
  0x17   :  { %523 = vmatpush3.bf16.msra.mxu0 %v520_v25 }
  0x18   :  { %525 = vmatprep.subr.bf16.mxu0 %v524_v28 }
  0x1b   :  { %527 = vmatpush3.bf16.msra.mxu0 %v524_v28 }
  0x1c   :  { %529 = vmatprep.subr.bf16.mxu0 %v528_v31 }
  0x1f   :  { %531 = vmatpush3.bf16.msra.mxu0 %v528_v31 }
  0x20   :  { %533 = vmatprep.subr.bf16.mxu0 %v532_v34 }
  0x23   :  { %535 = vmatpush3.bf16.msra.mxu0 %v532_v34 }
  0x24   :  { %537 = vmatprep.subr.bf16.mxu0 %v536_v37 }
  0x27   :  { %539 = vmatpush3.bf16.msra.mxu0 %v536_v37  ;;  %v279_v37 = vld [vmem:[#allocation2 + $0x8] sm:$0xff] }
  0xdf   :  { %v445_v39 = vpop.f32.mrb[0].mxu1 }
  0xe0   :  { %v705_v40 = vpop.f32.mrb[1].mxu1  ;;  %v133_v31 = vadd.f32 %v445_v39, %v399_v24 }
  0xe1   :  { %v128_v33 = vadd.f32 %v399_v24, %v705_v40 }
  0xe7   :  { %v456_v42 = vpop.f32.mrb[2].mxu1 }
  0xe8   :  { %v219_v43 = vadd.f32 %v456_v42, %v402_v41  ;;  %v213_v44 = vpop.f32.mrb[3].mxu1 }
  0xe9   :  { %v214_v45 = vadd.f32 %v402_v41, %v213_v44 }
  0xea   :  { %v225_v46 = vmul.f32 0.70710677, %v219_v43  ;;  %v223_v26 = vmul.f32 0.5, %v219_v43 }
  0xeb   :  { %v224_v47 = vmul.f32 0.70710677, %v214_v45  ;;  %v222_v29 = vmul.f32 0.5, %v214_v45 }
  0xec   :  { %v227_v48 = vand.u32 2147483647, %v225_v46  ;;  %vm267_vm1 = vcmp.lt.f32.partialorder %v225_v46, 0.0 }
  0xed   :  { %v226_v49 = vand.u32 2147483647, %v224_v47  ;;  %vm266_vm2 = vcmp.lt.f32.partialorder %v224_v47, 0.0 }
  0xee   :  { %v229_v50 = vmul.f32 0.3275911, %v227_v48  ;;  %v255_v54 = vsub.f32 0.0, %v227_v48 }
  0xef   :  { %v228_v51 = vmul.f32 0.3275911, %v226_v49  ;;  %v254_v55 = vsub.f32 0.0, %v226_v49 }
  0xf0   :  { %v231_v52 = vadd.f32 1.0, %v229_v50  ;;  %v257_v57 = vmul.f32 %v255_v54, %v227_v48 }
  0xf1   :  { %v230_v53 = vadd.f32 1.0, %v228_v51  ;;  %v256_v60 = vmul.f32 %v254_v55, %v226_v49 }
  0xf2   :  { %543 = vrcp.f32 %v231_v52  ;;  %v260_v63 = vmul.f32 1.442695, %v257_v57 }
  0xf3   :  { %545 = vrcp.f32 %v230_v53  ;;  %v258_v2 = vmul.f32 1.442695, %v256_v60 }
  0xf4   :  { %547 = vpow2.f32 %v260_v63 }
  0xf5   :  { %549 = vpow2.f32 %v258_v2 }
  0xfc   :  { %v544_v56 = vpop.eup %543 }
  0xfd   :  { %v546_v58 = vpop.eup %545  ;;  %v237_v59 = vmul.f32 1.0614054, %v544_v56 }
  0xfe   :  { %v236_v61 = vmul.f32 1.0614054, %v546_v58  ;;  %v548_v15 = vpop.eup %547 }
  0xff   :  { %v239_v62 = vadd.f32 -1.4531521, %v237_v59  ;;  %v550_v17 = vpop.eup %549 }
 0x100   :  { %v238_v0 = vadd.f32 -1.4531521, %v236_v61 }
 0x101   :  { %v241_v1 = vmul.f32 %v544_v56, %v239_v62 }
 0x102   :  { %v240_v3 = vmul.f32 %v546_v58, %v238_v0 }
 0x103   :  { %v243_v4 = vadd.f32 1.4214138, %v241_v1 }
 0x104   :  { %v242_v5 = vadd.f32 1.4214138, %v240_v3 }
 0x105   :  { %v245_v6 = vmul.f32 %v544_v56, %v243_v4 }
 0x106   :  { %v244_v7 = vmul.f32 %v546_v58, %v242_v5 }
 0x107   :  { %v247_v8 = vadd.f32 -0.28449672, %v245_v6 }
 0x108   :  { %v246_v9 = vadd.f32 -0.28449672, %v244_v7 }
 0x109   :  { %v249_v10 = vmul.f32 %v544_v56, %v247_v8 }
 0x10a   :  { %v248_v11 = vmul.f32 %v546_v58, %v246_v9 }
 0x10b   :  { %v251_v12 = vadd.f32 0.2548296, %v249_v10 }
 0x10c   :  { %v250_v13 = vadd.f32 0.2548296, %v248_v11 }
 0x10d   :  { %v253_v14 = vmul.f32 %v544_v56, %v251_v12 }
 0x10e   :  { %v252_v16 = vmul.f32 %v546_v58, %v250_v13 }
 0x10f   :  { %v263_v18 = vmul.f32 %v548_v15, %v253_v14 }
 0x110   :  { %v262_v19 = vmul.f32 %v550_v17, %v252_v16 }
 0x111   :  { %v265_v20 = vsub.f32 1.0, %v263_v18 }
 0x112   :  { %v264_v21 = vsub.f32 1.0, %v262_v19 }
 0x113   :  { %v269_v22 = vsub.f32 0.0, %v265_v20 }
 0x114   :  { %v268_v23 = vsub.f32 0.0, %v264_v21 }
 0x115   :  { %v271_v25 = vsel %vm267_vm1, %v269_v22, %v265_v20 }
 0x116   :  { %v273_v27 = vadd.f32 1.0, %v271_v25  ;;  %v270_v28 = vsel %vm266_vm2, %v268_v23, %v264_v21 }
 0x117   :  { %v272_v30 = vadd.f32 1.0, %v270_v28 }
 0x118   :  { %v275_v32 = vmul.f32 %v273_v27, %v223_v26 }
 0x119   :  { %v274_v34 = vmul.f32 %v272_v30, %v222_v29 }
 0x11a   :  { %v277_v35 = vmul.f32 %v275_v32, %v133_v31 }
 0x11b   :  { %v276_v36 = vmul.f32 %v274_v34, %v128_v33 }
 0x11d   :  { %489 = vmatprep.mubr.f32.mxu0 %v276_v36 }
 0x11e   :  { %490 = vmatmul.mubr.f32.vlgmr.msra.gmra.mrb[0].mxu0 %v277_v35 }
 0x1f1   :  { %v491_v41 = vpop.f32.mrb[0].mxu0 }
 0x1f2   :  { %v372_v42 = vadd.f32 %v491_v41, %v279_v37  ;;  %v362_v44 = vpop.f32.mrb[1].mxu0 }
 0x1f3   :  { %v371_v46 = vadd.f32 %v362_v44, %v278_v38 }
 0x1f4   :  { %374 = vst.msk [vmem:[#allocation2 + $0x8] sm:$0xff] %vm38_vm0, %v372_v42 }
 0x1f5   :  { %373 = vst.msk [vmem:[#allocation2] sm:$0xff] %vm38_vm0, %v371_v46 }
 0x1fb   :  { %v379_v39 = vld [vmem:[#allocation2 + $0x8] sm:$0xff] }
 0x1fc   :  { %v378_v40 = vld [vmem:[#allocation2] sm:$0xff]  ;;  %381 = vst.msk [vmem:[#allocation3 + $0x8] sm:$0xff] %vm38_vm0, %v379_v39 }
 0x1fd   :  { %380 = vst.msk [vmem:[#allocation3] sm:$0xff] %vm38_vm0, %v378_v40 }
 0x1fe   :  { %562 = shalt.err (!%p559_p4)
}
 0x1ff   :  { %s563_s8 = scalar_lea.hbm %s737_s7, 256 }
 0x200   :  { %p564_p5 = scmp.ne.s32.totalorder %s737_s7, %s563_s8  ;;  %p567_p6 = scmp.lt.u32.totalorder %s563_s8, %s737_s7 }
 0x202   :  { %p569_p7 = pnand %p567_p6, %p564_p5 }
 0x204   :  { %572 = shalt.err (!%p569_p7)
}
 0x205   :  { %s576_s13 = smov 128   ;;  %s577_s14 = smov 8  }
 0x206   :  { %393 = dma.vmem_to_hbm [thread:$0]  %s388_s6, 256, %s737_s7, [#allocation4], %s576_s13, %s576_s13, %s577_s14  }
 0x207   :  { %573 = dma.done.wait [#allocation4], 256  }
 0x208   :  { %574 = vsyncadd [#allocation4], 4294967040 }
 0x209   :  { %397 = vsyncpa [#allocation4], 1 }

</bundles_post_ra>
